<compile_context>
chip_gen: v7x
topology: tpu7x:2x2x1
jax: 0.10.0
libtpu: 0.0.40
codegen_flags: <defaults>
</compile_context>

<pallas_src>
import jax
import jax.numpy as jnp
from jax import lax
from jax.experimental import pallas as pl
from jax.experimental.pallas import tpu as pltpu

_NEG_BIG = -1e30  # finite "minus infinity" (avoids inf - inf NaNs under row masking)


def _make_kernel(*, inv_t, n_rows, tile_r, tiles_per_core, mask_rows, diag_mode):
    """Row-tiled kernel body with the static configuration baked in.

    diag_mode:
      "single"   : one tile covers the whole matrix -> plain (n, n) diagonal mask.
      "slice128" : tile_r % 128 == 0 and tile_r | N  -> slice the (tile_r, tile_r)
                   diagonal window out of the resident row tile (no extra DMA).
      "maskfull" : general fallback -> full-tile iota mask (safe; handles ragged tails).
    """

    def kernel(x_ref, colmax_ref, colsum_ref, scal_ref, acc_ref):
        c = pl.program_id(0)                    # core / row-range index (parallel axis)
        i = pl.program_id(1)                    # tile index within this core
        tile_idx = c * tiles_per_core + i       # global row-tile index

        @pl.when(i == 0)
        def _init():
            colmax_ref[0] = jnp.full(colmax_ref.shape[1:], _NEG_BIG, jnp.float32)
            colsum_ref[0] = jnp.zeros(colsum_ref.shape[1:], jnp.float32)
            acc_ref[0] = jnp.float32(0.0)
            acc_ref[1] = jnp.float32(0.0)

        x = x_ref[...]
        if x.dtype != jnp.float32:
            x = x.astype(jnp.float32)
        tr, m = x.shape
        r0 = tile_idx * tile_r

        if mask_rows:
            row_ids = r0 + lax.broadcasted_iota(jnp.int32, (tr, 1), 0)
            valid = row_ids < n_rows                       # (tr, 1) bool
            xm = jnp.where(valid, x, _NEG_BIG)             # padded rows -> very negative
        else:
            valid = None
            xm = x

        # ---- row-wise logsumexp (exact per-row stabilisation); single (tr, m) exp pass.
        row_max = jnp.max(xm, axis=1, keepdims=True)       # (tr, 1)  raw units
        e = jnp.exp((xm - row_max) * inv_t)                # (tr, m)  the only big exp
        row_sum = jnp.sum(e, axis=1, keepdims=True)        # (tr, 1)
        row_lse = jnp.log(row_sum) + row_max * inv_t       # (tr, 1)  scaled units

        # ---- per-tile column contribution, re-using `e`:
        #   exp(s[r,c] - tile_max) = e[r,c] * exp((row_max[r] - tile_max_raw)/T)
        tile_max_raw = jnp.max(row_max)                    # scalar, raw units
        w = jnp.exp((row_max - tile_max_raw) * inv_t)      # (tr, 1); 0 on padded rows
        col_contrib = jnp.sum(e * w, axis=0, keepdims=True)  # (1, m)
        tile_max = tile_max_raw * inv_t                    # scalar, scaled units

        # ---- online column logsumexp accumulation (per-core running stats).
        old_max = colmax_ref[0]                            # (1, m)
        new_max = jnp.maximum(old_max, tile_max)
        colsum_ref[0] = (colsum_ref[0] * jnp.exp(old_max - new_max)
                         + col_contrib * jnp.exp(tile_max - new_max))
        colmax_ref[0] = new_max

        # ---- diagonal of this row tile (columns [r0, r0 + tile_r)).
        if diag_mode == "slice128":
            c0 = pl.multiple_of(tile_idx * tile_r, 128)
            d = x_ref[:, pl.ds(c0, tile_r)]                # view of the resident tile
            if d.dtype != jnp.float32:
                d = d.astype(jnp.float32)
            rr = lax.broadcasted_iota(jnp.int32, (tr, tile_r), 0)
            cc = lax.broadcasted_iota(jnp.int32, (tr, tile_r), 1)
            diag_sum_raw = jnp.sum(jnp.where(rr == cc, d, 0.0))
        elif diag_mode == "single":
            rr = lax.broadcasted_iota(jnp.int32, (tr, m), 0)
            cc = lax.broadcasted_iota(jnp.int32, (tr, m), 1)
            diag_sum_raw = jnp.sum(jnp.where(rr == cc, x, 0.0))
        else:  # "maskfull" (ragged tail rows have rr >= n, so they never match cc)
            rr = r0 + lax.broadcasted_iota(jnp.int32, (tr, m), 0)
            cc = lax.broadcasted_iota(jnp.int32, (tr, m), 1)
            diag_sum_raw = jnp.sum(jnp.where(rr == cc, x, 0.0))

        if mask_rows:
            row_lse_sum = jnp.sum(jnp.where(valid, row_lse, 0.0))
        else:
            row_lse_sum = jnp.sum(row_lse)

        diag_scaled = diag_sum_raw * inv_t
        # acc[0]: sum_k (s[k,k] - row_lse[k])   (per-tile difference: tighter numerics)
        # acc[1]: sum_k  s[k,k]                 (needed again for the column-side loss)
        acc_ref[0] = acc_ref[0] + (diag_scaled - row_lse_sum)
        acc_ref[1] = acc_ref[1] + diag_scaled

        @pl.when(i == tiles_per_core - 1)
        def _finish():
            lanes = lax.broadcasted_iota(jnp.int32, (1, 128), 1)
            v = jnp.where(lanes == 0, acc_ref[0], 0.0)
            v = v + jnp.where(lanes == 1, acc_ref[1], 0.0)
            scal_ref[0] = v

    return kernel


def _vmem_capacity_bytes():
    try:
        return int(pltpu.get_tpu_info().vmem_capacity_bytes)
    except Exception:
        return 64 * 1024 * 1024   # conservative (v7x-sized) fallback


def _pick_tile_rows(n, m, itemsize, vmem_cap):
    # Budget: double-buffered input tile + ~4 live full-tile f32 temporaries.
    budget = int(vmem_cap * 0.45)

    def fits(tr):
        return (2 * tr * m * itemsize + 4 * tr * m * 4) <= budget

    if n <= 512 and fits(n):
        return n                                     # single-tile fast path

    sub = 16 if itemsize < 4 else 8                  # sublane tile for the dtype
    divisors = [d for d in range(sub, min(n, 512) + 1, sub)
                if n % d == 0 and fits(d)]
    if divisors:
        best = max(divisors)
        mult128 = [d for d in divisors if d % 128 == 0]
        if mult128 and 2 * max(mult128) >= best:
            return max(mult128)                      # enables the 128-aligned diag slice
        return best
    for tr in (512, 256, 128, 64, 32, 16, 8):        # ragged fallback (masked last tile)
        if tr <= n and fits(tr):
            return tr
    return 8


def norm_softmax_loss(x, temperature=0.05):
    """Pallas TPU implementation of NormSoftmaxLoss.forward. Returns a scalar (f32)."""
    n, m = x.shape
    assert n == m, "expects a square similarity matrix (diagonal positives)"
    itemsize = jnp.dtype(x.dtype).itemsize

    vmem_cap = _vmem_capacity_bytes()
    tile_r = _pick_tile_rows(n, m, itemsize, vmem_cap)
    n_tiles = pl.cdiv(n, tile_r)
    mask_rows = (n % tile_r) != 0

    # Leading "parallel" axis of size 2: on v7x each half of the row range runs on its
    # own TensorCore; on single-TC chips it runs serially with identical total work.
    num_cores = 2 if (n_tiles >= 2 and n_tiles % 2 == 0) else 1
    tiles_per_core = n_tiles // num_cores

    if n_tiles == 1:
        diag_mode = "single"
    elif (not mask_rows) and tile_r % 128 == 0:
        diag_mode = "slice128"
    else:
        diag_mode = "maskfull"

    kernel = _make_kernel(
        inv_t=float(1.0 / temperature), n_rows=n, tile_r=tile_r,
        tiles_per_core=tiles_per_core, mask_rows=mask_rows, diag_mode=diag_mode)

    in_specs = [pl.BlockSpec((tile_r, m), lambda c, i: (c * tiles_per_core + i, 0))]

    out_shape = (
        jax.ShapeDtypeStruct((num_cores, 1, m), jnp.float32),     # per-core col max
        jax.ShapeDtypeStruct((num_cores, 1, m), jnp.float32),     # per-core col sum-exp
        jax.ShapeDtypeStruct((num_cores, 1, 128), jnp.float32),   # per-core scalar accs
    )
    out_specs = (
        pl.BlockSpec((1, 1, m), lambda c, i: (c, 0, 0)),
        pl.BlockSpec((1, 1, m), lambda c, i: (c, 0, 0)),
        pl.BlockSpec((1, 1, 128), lambda c, i: (c, 0, 0)),
    )

    est_vmem = (2 * tile_r * m * itemsize           # double-buffered input tile
                + 4 * tile_r * m * 4                # live f32 full-tile temporaries
                + 6 * m * 4 + 2 * 128 * 4)          # column-stat / scalar output blocks
    vmem_limit = int(min(int(vmem_cap * 0.9),
                         max(32 * 1024 * 1024, est_vmem + (8 << 20))))

    grid_spec = pltpu.PrefetchScalarGridSpec(
        num_scalar_prefetch=0,
        grid=(num_cores, tiles_per_core),
        in_specs=in_specs,
        out_specs=out_specs,
        scratch_shapes=[pltpu.SMEM((2,), jnp.float32)],   # [sum(diag - row_lse), sum diag]
    )

    col_max, col_sum, scal = pl.pallas_call(
        kernel,
        out_shape=out_shape,
        grid_spec=grid_spec,
        compiler_params=pltpu.CompilerParams(
            dimension_semantics=("parallel", "arbitrary"),
            vmem_limit_bytes=vmem_limit),
        cost_estimate=pl.CostEstimate(
            flops=int(10 * n * m),
            transcendentals=int(n * m + 4 * n + 4 * m),
            bytes_accessed=int(n * m * itemsize + num_cores * (2 * m + 128) * 4)),
    )(x)

    # Tiny JAX epilogue: combine per-core partial statistics (O(num_cores * N) work).
    gmax = jnp.max(col_max, axis=0)                                  # (1, m)
    total = jnp.sum(col_sum * jnp.exp(col_max - gmax), axis=0)       # (1, m)
    sum_col_lse = jnp.sum(jnp.log(total) + gmax)
    acc_diff = jnp.sum(scal[:, 0, 0])    # sum_k (s[k,k] - row_lse[k])
    acc_diag = jnp.sum(scal[:, 0, 1])    # sum_k  s[k,k]
    return -(acc_diff + acc_diag - sum_col_lse) / jnp.float32(n)


def _reference(x, temperature=0.05):
    # Pure-JAX reference mirroring the PyTorch module.
    i_sim = x / temperature
    i_logsm = jax.nn.log_softmax(i_sim - jnp.max(i_sim, axis=1, keepdims=True), axis=1)
    j_sim = x.T / temperature
    j_logsm = jax.nn.log_softmax(j_sim - jnp.max(j_sim, axis=1, keepdims=True), axis=1)
    loss_i = jnp.mean(jnp.diag(i_logsm))
    loss_j = jnp.mean(jnp.diag(j_logsm))
    return -loss_i - loss_j


if __name__ == "__main__":
    key = jax.random.PRNGKey(0)

    # Square cosine-similarity-like matrices in [-1, 1].  Sizes exercise:
    #  16   -> single-tile path
    #  1024 -> dual "core" split + 128-aligned diag-slice fast path
    #  640  -> dual split with a non-128-multiple aligned tile (masked diag fallback)
    #  600  -> odd tile count, single split, aligned non-128 tile
    for idx, n in enumerate((16, 1024, 640, 600)):
        k = jax.random.fold_in(key, idx)
        x = jnp.tanh(jax.random.normal(k, (n, n), dtype=jnp.float32))
        loss = jax.block_until_ready(norm_softmax_loss(x, temperature=0.05))
        ref = _reference(x, temperature=0.05)
        assert jnp.allclose(loss, ref, rtol=1e-3, atol=1e-3), (n, float(loss), float(ref))

    print("KERNEL_OK")
</pallas_src>

<mosaic_0001>
module attributes {stable_mosaic.version = 11 : i64} {
  func.func @kernel(%arg0: i32, %arg1: i32, %arg2: memref<16x16xf32, #tpu.memory_space<vmem>>, %arg3: memref<1x1x16xf32, #tpu.memory_space<vmem>>, %arg4: memref<1x1x16xf32, #tpu.memory_space<vmem>>, %arg5: memref<1x1x128xf32, #tpu.memory_space<vmem>>, %arg6: memref<2xf32, #tpu.memory_space<smem>>) attributes {dimension_semantics = [#tpu.dimension_semantics<parallel>, #tpu.dimension_semantics<arbitrary>], iteration_bounds = array<i64: 1, 1>, scalar_prefetch = 0 : i64, scratch_operands = 1 : i64, tpu.core_type = #tpu.core_type<tc>, window_params = [{transform_indices = @transform_0, window_bounds = array<i64: 16, 16>}, {transform_indices = @transform_1, window_bounds = array<i64: 1, 1, 16>}, {transform_indices = @transform_2, window_bounds = array<i64: 1, 1, 16>}, {transform_indices = @transform_3, window_bounds = array<i64: 1, 1, 128>}]} {
    %c0_i32 = arith.constant 0 : i32
    %0 = arith.cmpi eq, %arg1, %c0_i32 : i32
    %1 = arith.extui %0 : i1 to i32
    %c0_i32_0 = arith.constant 0 : i32
    %2 = arith.cmpi ne, %1, %c0_i32_0 : i32
    scf.if %2 {
      %cst_30 = arith.constant -1.000000e+30 : f32
      %75 = vector.broadcast %cst_30 : f32 to vector<1x16xf32>
      %c0_31 = arith.constant 0 : index
      %c0_32 = arith.constant 0 : index
      %c0_33 = arith.constant 0 : index
      %76 = vector.load %arg3[%c0_31, %c0_32, %c0_33] : memref<1x1x16xf32, #tpu.memory_space<vmem>>, vector<1x1x16xf32>
      %77 = vector.shape_cast %76 : vector<1x1x16xf32> to vector<1x16xf32>
      %78 = vector.shape_cast %75 : vector<1x16xf32> to vector<1x1x16xf32>
      tpu.vector_store %arg3[%c0_31, %c0_32, %c0_33], %78 {strides = array<i32>} : memref<1x1x16xf32, #tpu.memory_space<vmem>>, vector<1x1x16xf32>,
      %cst_34 = arith.constant 0.000000e+00 : f32
      %79 = vector.broadcast %cst_34 : f32 to vector<1x16xf32>
      %c0_35 = arith.constant 0 : index
      %c0_36 = arith.constant 0 : index
      %c0_37 = arith.constant 0 : index
      %80 = vector.load %arg4[%c0_35, %c0_36, %c0_37] : memref<1x1x16xf32, #tpu.memory_space<vmem>>, vector<1x1x16xf32>
      %81 = vector.shape_cast %80 : vector<1x1x16xf32> to vector<1x16xf32>
      %82 = vector.shape_cast %79 : vector<1x16xf32> to vector<1x1x16xf32>
      tpu.vector_store %arg4[%c0_35, %c0_36, %c0_37], %82 {strides = array<i32>} : memref<1x1x16xf32, #tpu.memory_space<vmem>>, vector<1x1x16xf32>,
      %cst_38 = arith.constant 0.000000e+00 : f32
      %c0_39 = arith.constant 0 : index
      %83 = memref.load %arg6[%c0_39] : memref<2xf32, #tpu.memory_space<smem>>
      memref.store %cst_38, %arg6[%c0_39] : memref<2xf32, #tpu.memory_space<smem>>
      %cst_40 = arith.constant 0.000000e+00 : f32
      %c1_41 = arith.constant 1 : index
      %84 = memref.load %arg6[%c1_41] : memref<2xf32, #tpu.memory_space<smem>>
      memref.store %cst_40, %arg6[%c1_41] : memref<2xf32, #tpu.memory_space<smem>>
    } else {
    }
    %c0 = arith.constant 0 : index
    %c0_1 = arith.constant 0 : index
    %3 = vector.load %arg2[%c0, %c0_1] : memref<16x16xf32, #tpu.memory_space<vmem>>, vector<16x16xf32>
    %cst = arith.constant dense<0xFF800000> : vector<16xf32>
    %4 = vector.multi_reduction <maximumf>, %3, %cst [1] : vector<16x16xf32> to vector<16xf32>
    %5 = vector.shape_cast %4 : vector<16xf32> to vector<16x1xf32>
    %6 = vector.broadcast %5 : vector<16x1xf32> to vector<16x16xf32>
    %7 = arith.subf %3, %6 : vector<16x16xf32>
    %cst_2 = arith.constant 2.000000e+01 : f32
    %8 = vector.broadcast %cst_2 : f32 to vector<16x16xf32>
    %9 = arith.mulf %7, %8 : vector<16x16xf32>
    %10 = math.exp %9 : vector<16x16xf32>
    %cst_3 = arith.constant dense<0.000000e+00> : vector<16xf32>
    %11 = vector.multi_reduction <add>, %10, %cst_3 [1] : vector<16x16xf32> to vector<16xf32>
    %12 = vector.shape_cast %11 : vector<16xf32> to vector<16x1xf32>
    %13 = math.log %12 : vector<16x1xf32>
    %cst_4 = arith.constant 2.000000e+01 : f32
    %14 = vector.broadcast %cst_4 : f32 to vector<16x1xf32>
    %15 = arith.mulf %5, %14 : vector<16x1xf32>
    %16 = arith.addf %13, %15 : vector<16x1xf32>
    %17 = vector.shape_cast %5 : vector<16x1xf32> to vector<1x16x1xf32>
    %cst_5 = arith.constant dense<0xFF800000> : vector<1xf32>
    %18 = vector.multi_reduction <maximumf>, %17, %cst_5 [1, 2] : vector<1x16x1xf32> to vector<1xf32>
    %19 = vector.shape_cast %18 : vector<1xf32> to vector<1x1x1xf32>
    %20 = vector.extract %19[0, 0, 0] : f32 from vector<1x1x1xf32>
    %21 = vector.broadcast %20 : f32 to vector<16x1xf32>
    %22 = arith.subf %5, %21 : vector<16x1xf32>
    %cst_6 = arith.constant 2.000000e+01 : f32
    %23 = vector.broadcast %cst_6 : f32 to vector<16x1xf32>
    %24 = arith.mulf %22, %23 : vector<16x1xf32>
    %25 = math.exp %24 : vector<16x1xf32>
    %26 = vector.broadcast %25 : vector<16x1xf32> to vector<16x16xf32>
    %27 = arith.mulf %10, %26 : vector<16x16xf32>
    %cst_7 = arith.constant dense<0.000000e+00> : vector<16xf32>
    %28 = vector.multi_reduction <add>, %27, %cst_7 [0] : vector<16x16xf32> to vector<16xf32>
    %29 = vector.shape_cast %28 : vector<16xf32> to vector<1x16xf32>
    %cst_8 = arith.constant 2.000000e+01 : f32
    %30 = arith.mulf %20, %cst_8 : f32
    %c0_9 = arith.constant 0 : index
    %c0_10 = arith.constant 0 : index
    %c0_11 = arith.constant 0 : index
    %31 = vector.load %arg3[%c0_9, %c0_10, %c0_11] : memref<1x1x16xf32, #tpu.memory_space<vmem>>, vector<1x1x16xf32>
    %32 = vector.shape_cast %31 : vector<1x1x16xf32> to vector<1x16xf32>
    %33 = vector.broadcast %30 : f32 to vector<1x16xf32>
    %34 = arith.maximumf %32, %33 : vector<1x16xf32>
    %c0_12 = arith.constant 0 : index
    %c0_13 = arith.constant 0 : index
    %c0_14 = arith.constant 0 : index
    %35 = vector.load %arg4[%c0_12, %c0_13, %c0_14] : memref<1x1x16xf32, #tpu.memory_space<vmem>>, vector<1x1x16xf32>
    %36 = vector.shape_cast %35 : vector<1x1x16xf32> to vector<1x16xf32>
    %37 = arith.subf %32, %34 : vector<1x16xf32>
    %38 = math.exp %37 : vector<1x16xf32>
    %39 = arith.mulf %36, %38 : vector<1x16xf32>
    %40 = vector.broadcast %30 : f32 to vector<1x16xf32>
    %41 = arith.subf %40, %34 : vector<1x16xf32>
    %42 = math.exp %41 : vector<1x16xf32>
    %43 = arith.mulf %29, %42 : vector<1x16xf32>
    %44 = arith.addf %39, %43 : vector<1x16xf32>
    %c0_15 = arith.constant 0 : index
    %c0_16 = arith.constant 0 : index
    %c0_17 = arith.constant 0 : index
    %45 = vector.load %arg4[%c0_15, %c0_16, %c0_17] : memref<1x1x16xf32, #tpu.memory_space<vmem>>, vector<1x1x16xf32>
    %46 = vector.shape_cast %45 : vector<1x1x16xf32> to vector<1x16xf32>
    %47 = vector.shape_cast %44 : vector<1x16xf32> to vector<1x1x16xf32>
    tpu.vector_store %arg4[%c0_15, %c0_16, %c0_17], %47 {strides = array<i32>} : memref<1x1x16xf32, #tpu.memory_space<vmem>>, vector<1x1x16xf32>,
    %c0_18 = arith.constant 0 : index
    %c0_19 = arith.constant 0 : index
    %c0_20 = arith.constant 0 : index
    %48 = vector.load %arg3[%c0_18, %c0_19, %c0_20] : memref<1x1x16xf32, #tpu.memory_space<vmem>>, vector<1x1x16xf32>
    %49 = vector.shape_cast %48 : vector<1x1x16xf32> to vector<1x16xf32>
    %50 = vector.shape_cast %34 : vector<1x16xf32> to vector<1x1x16xf32>
    tpu.vector_store %arg3[%c0_18, %c0_19, %c0_20], %50 {strides = array<i32>} : memref<1x1x16xf32, #tpu.memory_space<vmem>>, vector<1x1x16xf32>,
    %51 = tpu.iota {dimensions = array<i32: 0>} : vector<16x16xi32>
    %52 = tpu.iota {dimensions = array<i32: 1>} : vector<16x16xi32>
    %53 = arith.cmpi eq, %51, %52 : vector<16x16xi32>
    %cst_21 = arith.constant 0.000000e+00 : f32
    %54 = vector.broadcast %cst_21 : f32 to vector<16x16xf32>
    %55 = arith.select %53, %3, %54 : vector<16x16xi1>, vector<16x16xf32>
    %56 = vector.shape_cast %55 : vector<16x16xf32> to vector<1x16x16xf32>
    %cst_22 = arith.constant dense<0.000000e+00> : vector<1xf32>
    %57 = vector.multi_reduction <add>, %56, %cst_22 [1, 2] : vector<1x16x16xf32> to vector<1xf32>
    %58 = vector.shape_cast %57 : vector<1xf32> to vector<1x1x1xf32>
    %59 = vector.extract %58[0, 0, 0] : f32 from vector<1x1x1xf32>
    %60 = vector.shape_cast %16 : vector<16x1xf32> to vector<1x16x1xf32>
    %cst_23 = arith.constant dense<0.000000e+00> : vector<1xf32>
    %61 = vector.multi_reduction <add>, %60, %cst_23 [1, 2] : vector<1x16x1xf32> to vector<1xf32>
    %62 = vector.shape_cast %61 : vector<1xf32> to vector<1x1x1xf32>
    %63 = vector.extract %62[0, 0, 0] : f32 from vector<1x1x1xf32>
    %cst_24 = arith.constant 2.000000e+01 : f32
    %64 = arith.mulf %59, %cst_24 : f32
    %c0_25 = arith.constant 0 : index
    %65 = memref.load %arg6[%c0_25] : memref<2xf32, #tpu.memory_space<smem>>
    %66 = arith.subf %64, %63 : f32
    %67 = arith.addf %65, %66 : f32
    %c0_26 = arith.constant 0 : index
    %68 = memref.load %arg6[%c0_26] : memref<2xf32, #tpu.memory_space<smem>>
    memref.store %67, %arg6[%c0_26] : memref<2xf32, #tpu.memory_space<smem>>
    %c1 = arith.constant 1 : index
    %69 = memref.load %arg6[%c1] : memref<2xf32, #tpu.memory_space<smem>>
    %70 = arith.addf %69, %64 : f32
    %c1_27 = arith.constant 1 : index
    %71 = memref.load %arg6[%c1_27] : memref<2xf32, #tpu.memory_space<smem>>
    memref.store %70, %arg6[%c1_27] : memref<2xf32, #tpu.memory_space<smem>>
    %c0_i32_28 = arith.constant 0 : i32
    %72 = arith.cmpi eq, %arg1, %c0_i32_28 : i32
    %73 = arith.extui %72 : i1 to i32
    %c0_i32_29 = arith.constant 0 : i32
    %74 = arith.cmpi ne, %73, %c0_i32_29 : i32
    scf.if %74 {
      %75 = tpu.iota {dimensions = array<i32: 1>} : vector<1x128xi32>
      %c0_i32_30 = arith.constant 0 : i32
      %76 = vector.broadcast %c0_i32_30 : i32 to vector<1x128xi32>
      %77 = arith.cmpi eq, %75, %76 : vector<1x128xi32>
      %c0_31 = arith.constant 0 : index
      %78 = memref.load %arg6[%c0_31] : memref<2xf32, #tpu.memory_space<smem>>
      %cst_32 = arith.constant 0.000000e+00 : f32
      %79 = vector.broadcast %78 : f32 to vector<1x128xf32>
      %80 = vector.broadcast %cst_32 : f32 to vector<1x128xf32>
      %81 = arith.select %77, %79, %80 : vector<1x128xi1>, vector<1x128xf32>
      %c1_i32 = arith.constant 1 : i32
      %82 = vector.broadcast %c1_i32 : i32 to vector<1x128xi32>
      %83 = arith.cmpi eq, %75, %82 : vector<1x128xi32>
      %c1_33 = arith.constant 1 : index
      %84 = memref.load %arg6[%c1_33] : memref<2xf32, #tpu.memory_space<smem>>
      %cst_34 = arith.constant 0.000000e+00 : f32
      %85 = vector.broadcast %84 : f32 to vector<1x128xf32>
      %86 = vector.broadcast %cst_34 : f32 to vector<1x128xf32>
      %87 = arith.select %83, %85, %86 : vector<1x128xi1>, vector<1x128xf32>
      %88 = arith.addf %81, %87 : vector<1x128xf32>
      %c0_35 = arith.constant 0 : index
      %c0_36 = arith.constant 0 : index
      %c0_37 = arith.constant 0 : index
      %89 = vector.load %arg5[%c0_35, %c0_36, %c0_37] : memref<1x1x128xf32, #tpu.memory_space<vmem>>, vector<1x1x128xf32>
      %90 = vector.shape_cast %89 : vector<1x1x128xf32> to vector<1x128xf32>
      %91 = vector.shape_cast %88 : vector<1x128xf32> to vector<1x1x128xf32>
      tpu.vector_store %arg5[%c0_35, %c0_36, %c0_37], %91 {strides = array<i32>} : memref<1x1x128xf32, #tpu.memory_space<vmem>>, vector<1x1x128xf32>,
    } else {
    }
    return
  }
  func.func @transform_0(%arg0: i32, %arg1: i32) -> (i32, i32) {
    %c1_i32 = arith.constant 1 : i32
    %0 = arith.muli %arg0, %c1_i32 : i32
    %1 = arith.addi %0, %arg1 : i32
    %c0_i32 = arith.constant 0 : i32
    %c0_i32_0 = arith.constant 0 : i32
    return %1, %c0_i32 : i32, i32
  }
  func.func @transform_1(%arg0: i32, %arg1: i32) -> (i32, i32, i32) {
    %c0_i32 = arith.constant 0 : i32
    %c0_i32_0 = arith.constant 0 : i32
    %c0_i32_1 = arith.constant 0 : i32
    return %arg0, %c0_i32, %c0_i32_0 : i32, i32, i32
  }
  func.func @transform_2(%arg0: i32, %arg1: i32) -> (i32, i32, i32) {
    %c0_i32 = arith.constant 0 : i32
    %c0_i32_0 = arith.constant 0 : i32
    %c0_i32_1 = arith.constant 0 : i32
    return %arg0, %c0_i32, %c0_i32_0 : i32, i32, i32
  }
  func.func @transform_3(%arg0: i32, %arg1: i32) -> (i32, i32, i32) {
    %c0_i32 = arith.constant 0 : i32
    %c0_i32_0 = arith.constant 0 : i32
    %c0_i32_1 = arith.constant 0 : i32
    return %arg0, %c0_i32, %c0_i32_0 : i32, i32, i32
  }
}

</mosaic_0001>

<bundles_post_ra>
// kernel: tpu_custom_call.1
= control target key start
LH: loop header
LB: loop body
LE: loop exit
PB: predicated region body
PF: predicated region fallthrough
CT: control target
= control target key end

     0   :  { %9 = vsyncpa [#allocation4], 0  ;;  %s451_s0 = inlined_call_operand.hbm [shape: f32[16,16], index: 0, kind: input, shape index: {}]   ;;  %s452_s1 = inlined_call_operand.hbm [shape: f32[1,1,16], index: 1, kind: output, shape index: {0}]   ;;  %s453_s2 = inlined_call_operand.hbm [shape: f32[1,1,16], index: 2, kind: output, shape index: {1}]   ;;  %s454_s3 = inlined_call_operand.hbm [shape: f32[1,1,128], index: 3, kind: output, shape index: {2}]  }
   0x1   :  { %10 = vsyncpa [#allocation5], 0 }
   0x2   :  { %11 = vsyncpa [#allocation8], 0  ;;  %s345_s12 = smov [#allocation3]   ;;  %s251_s16 = scalar_lea.hbm %s451_s0, 256 }
   0x3   :  { %s21_s13 = sshll.u32 %s345_s12, 4  ;;  %p252_p0 = scmp.ne.s32.totalorder %s451_s0, %s251_s16  ;;  %s22_s13 = int_to_ptr.vmem [resolvable:$true] %s21_s13 }
   0x4   :  { %p255_p1 = scmp.lt.u32.totalorder %s251_s16, %s451_s0 }
   0x6   :  { %p257_p2 = pnand %p255_p1, %p252_p0 }
   0x8   :  { %260 = shalt.err (!%p257_p2)
}
   0x9   :  { %s261_s21 = scalar_lea.vmem %s22_s13, 256  ;;  %p266_p4 = scmp.lt.s32.totalorder %s22_s13, %s22_s13 }
   0xa   :  { %p262_p3 = scmp.ne.s32.totalorder %s22_s13, %s261_s21  ;;  %p267_p5 = scmp.lt.s32.totalorder %s261_s21, %s261_s21 }
   0xc   :  { %p268_p6 = por %p267_p5, %p266_p4 }
   0xe   :  { %p269_p7 = pnand %p268_p6, %p262_p3 }
  0x10   :  { %272 = shalt.err (!%p269_p7)
}
  0x11   :  { %s346_s22 = smov 128   ;;  %s347_s23 = smov 8  }
  0x12   :  { %27 = dma.hbm_to_vmem [thread:$0]  %s451_s0, 256, %s22_s13, [#allocation4], %s346_s22, %s346_s22, %s347_s23  }
  0x13   :  { %339 = dma.done.wait [#allocation4], 256  }
  0x14   :  { %340 = vsyncadd [#allocation4], 4294967040  ;;  %vm46_vm0 = vcmask 130048   ;;  %v44_v0 = vld [vmem:[#allocation3] sm:$0xff]  ;;  %v45_v1 = vld [vmem:[#allocation3 + $0x8] sm:$0xff]  ;;  %vm37_vm1 = vcmask 122880   ;;  %v120_v25 = vlaneseq }
  0x15   :  { %v47_v2 = vsel %vm46_vm0, %v44_v0, -inf  ;;  %v50_v3 = vsel %vm46_vm0, %v45_v1, -inf  ;;  %v348_v4 = vmov -1e+30   ;;  %v349_v5 = vmov 0.0   ;;  %s350_s27 = smov [#allocation7]  }
  0x16   :  { %48 = vmax.xlane.f32.xlu0 %v47_v2  ;;  %38 = vst.msk [vmem:[#allocation6] sm:$0x1] %vm37_vm1, %v348_v4  ;;  %39 = vst.msk [vmem:[#allocation7] sm:$0x1] %vm37_vm1, %v349_v5  ;;  %v121_v26 = vshrl.u32 %v120_v25, 7  ;;  %v399_v28 = vand.u32 127, %v120_v25 }
  0x17   :  { %vm141_vm4 = vcmask 7168   ;;  %s193_s28 = sshll.u32 %s350_s27, 4  ;;  %s351_s29 = smov [#allocation6]   ;;  %s194_s28 = int_to_ptr.vmem [resolvable:$true] %s193_s28 }
  0x18   :  { %v122_v27 = vadd.s32 8, %v121_v26  ;;  %vm125_vm2 = vcmp.eq.s32.totalorder %v121_v26, %v399_v28  ;;  %s183_s30 = sshll.u32 %s351_s29, 4  ;;  %s273_s4 = scalar_lea.vmem %s194_s28, 16  ;;  %s184_s30 = int_to_ptr.vmem [resolvable:$true] %s183_s30 }
  0x19   :  { %v127_v29 = vsel %vm125_vm2, %v44_v0, 0.0  ;;  %p274_p8 = scmp.ne.s32.totalorder %s194_s28, %s273_s4  ;;  %s277_s5 = scalar_lea.vmem %s194_s28, 32 }
  0x1a   :  { %51 = vmax.xlane.f32.xlu0 %v50_v3  ;;  %vm126_vm3 = vcmp.eq.s32.totalorder %v122_v27, %v399_v28  ;;  %v129_v31 = vsel %vm46_vm0, %v127_v29, 0.0  ;;  %p278_p9 = scmp.lt.s32.totalorder %s194_s28, %s194_s28  ;;  %p279_p10 = scmp.lt.s32.totalorder %s277_s5, %s273_s4 }
  0x1b   :  { %v128_v30 = vsel %vm126_vm3, %v45_v1, 0.0 }
  0x1c   :  { %v130_v32 = vsel %vm46_vm0, %v128_v30, 0.0  ;;  %p280_p11 = por %p279_p10, %p278_p9 }
  0x1d   :  { %v131_v33 = vadd.f32 %v130_v32, %v129_v31  ;;  %v104_v35 = vld [vmem:[#allocation6] sm:$0x1]  ;;  %v107_v61 = vld [vmem:[#allocation7] sm:$0x1] }
  0x1e   :  { %p281_p12 = pnand %p280_p11, %p274_p8 }
  0x1f   :  { %132 = vadd.xlane.f32.xlu0 %v131_v33 }
  0xa3   :  { %v389_v6 = vpop.xlane.xlu0 %48 }
  0xa4   :  { %v53_v7 = vsub.f32 %v44_v0, %v389_v6 }
  0xa6   :  { %v55_v8 = vmul.f32 20.0, %v53_v7 }
  0xa7   :  { %v392_v9 = vpop.xlane.xlu0 %51 }
  0xa8   :  { %v57_v10 = vmul.f32 1.442695, %v55_v8  ;;  %v54_v11 = vsub.f32 %v45_v1, %v392_v9  ;;  %v75_v12 = vmax.f32 %v389_v6, %v392_v9  ;;  %v71_v8 = vmul.f32 20.0, %v389_v6 }
  0xaa   :  { %235 = vpow2.f32 %v57_v10  ;;  %v56_v13 = vmul.f32 20.0, %v54_v11  ;;  %v76_v14 = vrot.slane %v75_v12, 4  ;;  %v72_v11 = vmul.f32 20.0, %v392_v9 }
  0xac   :  { %v59_v15 = vmul.f32 1.442695, %v56_v13  ;;  %v77_v16 = vmax.f32 %v75_v12, %v76_v14 }
  0xae   :  { %237 = vpow2.f32 %v59_v15  ;;  %v78_v17 = vrot.slane %v77_v16, 2 }
  0xb0   :  { %v79_v18 = vmax.f32 %v77_v16, %v78_v17 }
  0xb2   :  { %v80_v19 = vrot.slane %v79_v18, 1 }
  0xb4   :  { %v236_v20 = vpop.eup %235  ;;  %v81_v21 = vmax.f32 %v79_v18, %v80_v19  ;;  %v133_v18 = vpop.xlane.xlu0 %132 }
  0xb5   :  { %v61_v22 = vsel %vm46_vm0, %v236_v20, 0.0  ;;  %v134_v19 = vrot.slane %v133_v18, 4 }
  0xb6   :  { %62 = vadd.xlane.f32.xlu1 %v61_v22  ;;  %221 = vpush %v81_v21 }
  0xb8   :  { %v238_v23 = vpop.eup %237 }
  0xb9   :  { %v64_v24 = vsel %vm46_vm0, %v238_v23, 0.0 }
  0xba   :  { %65 = vadd.xlane.f32.xlu1 %v64_v24 }
  0xe7   :  { %s222_s0 = spop %221 }
  0xe8   :  { %v83_v34 = vstv %s222_s0  ;;  %s103_s26 = smul.f32 20.0, %s222_s0 }
  0xe9   :  { %v84_v36 = vsub.f32 %v389_v6, %v83_v34  ;;  %v85_v37 = vsub.f32 %v392_v9, %v83_v34 }
  0xea   :  { %v105_v38 = vstv %s103_s26 }
  0xeb   :  { %v86_v39 = vmul.f32 20.0, %v84_v36  ;;  %v87_v40 = vmul.f32 20.0, %v85_v37  ;;  %v106_v41 = vmax.f32 %v104_v35, %v105_v38 }
  0xed   :  { %v88_v42 = vmul.f32 1.442695, %v86_v39  ;;  %v90_v43 = vmul.f32 1.442695, %v87_v40  ;;  %119 = vst.msk [vmem:[#allocation6] sm:$0x1] %vm37_vm1, %v106_v41  ;;  %v108_v44 = vsub.f32 %v104_v35, %v106_v41  ;;  %v112_v46 = vsub.f32 %v105_v38, %v106_v41 }
  0xef   :  { %239 = vpow2.f32 %v88_v42  ;;  %v109_v50 = vmul.f32 1.442695, %v108_v44  ;;  %v113_v53 = vmul.f32 1.442695, %v112_v46 }
  0xf0   :  { %241 = vpow2.f32 %v90_v43 }
  0xf1   :  { %243 = vpow2.f32 %v109_v50 }
  0xf2   :  { %245 = vpow2.f32 %v113_v53 }
  0xf9   :  { %v240_v45 = vpop.eup %239 }
  0xfa   :  { %v242_v47 = vpop.eup %241  ;;  %v92_v48 = vmul.f32 %v240_v45, %v236_v20  ;;  %v135_v20 = vadd.f32 %v134_v19, %v133_v18 }
  0xfb   :  { %v93_v49 = vmul.f32 %v242_v47, %v238_v23  ;;  %v244_v60 = vpop.eup %243 }
  0xfc   :  { %v94_v51 = vsel %vm46_vm0, %v92_v48, 0.0  ;;  %v246_v63 = vpop.eup %245  ;;  %v111_v0 = vmul.f32 %v244_v60, %v107_v61  ;;  %v136_v21 = vrot.slane %v135_v20, 2 }
  0xfd   :  { %v95_v52 = vsel %vm46_vm0, %v93_v49, 0.0 }
  0xfe   :  { %v96_v54 = vadd.f32 %v95_v52, %v94_v51  ;;  %v137_v22 = vadd.f32 %v136_v21, %v135_v20 }
 0x100   :  { %v97_v55 = vrot.slane %v96_v54, 4  ;;  %v138_v23 = vrot.slane %v137_v22, 1 }
 0x102   :  { %v98_v56 = vadd.f32 %v97_v55, %v96_v54  ;;  %v139_v24 = vadd.f32 %v138_v23, %v137_v22 }
 0x104   :  { %v99_v57 = vrot.slane %v98_v56, 2  ;;  %223 = vpush %v139_v24 }
 0x106   :  { %v100_v58 = vadd.f32 %v99_v57, %v98_v56 }
 0x108   :  { %v101_v59 = vrot.slane %v100_v58, 1 }
 0x10a   :  { %v102_v62 = vadd.f32 %v101_v59, %v100_v58 }
 0x10c   :  { %v115_v1 = vmul.f32 %v246_v63, %v102_v62 }
 0x10e   :  { %v116_v2 = vadd.f32 %v115_v1, %v111_v0 }
 0x110   :  { %118 = vst.msk [vmem:[#allocation7] sm:$0x1] %vm37_vm1, %v116_v2 }
 0x143   :  { %v63_v3 = vpop.xlane.xlu1 %62 }
 0x144   :  { %247 = vlog2.f32 %v63_v3 }
 0x147   :  { %v66_v4 = vpop.xlane.xlu1 %65 }
 0x148   :  { %249 = vlog2.f32 %v66_v4 }
 0x14e   :  { %v248_v5 = vpop.eup %247 }
 0x14f   :  { %v68_v7 = vmul.f32 0.6931472, %v248_v5 }
 0x151   :  { %v73_v13 = vadd.f32 %v71_v8, %v68_v7 }
 0x152   :  { %v250_v10 = vpop.eup %249 }
 0x153   :  { %v70_v12 = vmul.f32 0.6931472, %v250_v10  ;;  %v142_v15 = vsel %vm141_vm4, %v73_v13, 0.0 }
 0x155   :  { %v74_v14 = vadd.f32 %v72_v11, %v70_v12 }
 0x157   :  { %v143_v16 = vsel %vm141_vm4, %v74_v14, 0.0 }
 0x158   :  { %v144_v17 = vadd.f32 %v143_v16, %v142_v15 }
 0x15a   :  { %145 = vadd.xlane.f32.xlu1 %v144_v17 }
 0x15b   :  { %284 = shalt.err (!%p281_p12)
}
 0x15c   :  { %s285_s8 = scalar_lea.hbm %s453_s2, 16 }
 0x15d   :  { %p286_p13 = scmp.ne.s32.totalorder %s453_s2, %s285_s8  ;;  %p289_p0 = scmp.lt.u32.totalorder %s285_s8, %s453_s2 }
 0x15f   :  { %p291_p1 = pnand %p289_p0, %p286_p13 }
 0x161   :  { %294 = shalt.err (!%p291_p1)
}
 0x162   :  { %196 = dma.vmem_to_hbm [thread:$0]  %s194_s28, 16, %s453_s2, [#allocation8]  }
 0x163   :  { %s295_s15 = scalar_lea.vmem %s184_s30, 16  ;;  %s299_s16 = scalar_lea.vmem %s184_s30, 32 }
 0x164   :  { %p296_p2 = scmp.ne.s32.totalorder %s184_s30, %s295_s15  ;;  %p300_p3 = scmp.lt.s32.totalorder %s184_s30, %s184_s30 }
 0x165   :  { %p301_p4 = scmp.lt.s32.totalorder %s299_s16, %s295_s15 }
 0x167   :  { %p302_p5 = por %p301_p4, %p300_p3 }
 0x169   :  { %p303_p6 = pnand %p302_p5, %p296_p2 }
 0x16b   :  { %306 = shalt.err (!%p303_p6)
}
 0x16c   :  { %s307_s19 = scalar_lea.hbm %s452_s1, 16 }
 0x16d   :  { %p308_p7 = scmp.ne.s32.totalorder %s452_s1, %s307_s19  ;;  %p311_p8 = scmp.lt.u32.totalorder %s307_s19, %s452_s1 }
 0x16f   :  { %p313_p9 = pnand %p311_p8, %p308_p7 }
 0x171   :  { %316 = shalt.err (!%p313_p9)
}
 0x172   :  { %186 = dma.vmem_to_hbm [thread:$0]  %s184_s30, 16, %s452_s1, [#allocation5]   ;;  %vm171_vm5 = vcmp.eq.s32.totalorder %v399_v28, 1  ;;  %vm167_vm6 = vcmp.eq.s32.totalorder %v399_v28, 0 }
 0x173   :  { %s224_s25 = spop %223  ;;  %s352_s28 = smov [#allocation9]  }
 0x174   :  { %s154_s0 = smul.f32 20.0, %s224_s25  ;;  %s203_s29 = sshll.u32 %s352_s28, 4  ;;  %s204_s29 = int_to_ptr.vmem [resolvable:$true] %s203_s29 }
 0x175   :  { %s317_s1 = scalar_lea.vmem %s204_s29, 16  ;;  %s321_s30 = scalar_lea.vmem %s204_s29, 32 }
 0x176   :  { %v173_v31 = vstv %s154_s0  ;;  %p318_p10 = scmp.ne.s32.totalorder %s204_s29, %s317_s1  ;;  %p322_p11 = scmp.lt.s32.totalorder %s204_s29, %s204_s29 }
 0x177   :  { %v174_v33 = vsel %vm171_vm5, %v173_v31, 0.0  ;;  %p323_p12 = scmp.lt.s32.totalorder %s321_s30, %s317_s1 }
 0x179   :  { %p324_p13 = por %p323_p12, %p322_p11 }
 0x17b   :  { %p325_p0 = pnand %p324_p13, %p318_p10 }
 0x1e7   :  { %v146_v6 = vpop.xlane.xlu1 %145 }
 0x1e8   :  { %v147_v9 = vrot.slane %v146_v6, 4 }
 0x1ea   :  { %v148_v25 = vadd.f32 %v147_v9, %v146_v6 }
 0x1ec   :  { %v149_v26 = vrot.slane %v148_v25, 2 }
 0x1ee   :  { %v150_v27 = vadd.f32 %v149_v26, %v148_v25 }
 0x1f0   :  { %v151_v29 = vrot.slane %v150_v27, 1 }
 0x1f2   :  { %v152_v30 = vadd.f32 %v151_v29, %v150_v27 }
 0x1f4   :  { %225 = vpush %v152_v30 }
 0x225   :  { %s226_s26 = spop %225 }
 0x226   :  { %s156_s27 = ssub.f32 %s154_s0, %s226_s26 }
 0x228   :  { %v169_v32 = vstv %s156_s27 }
 0x229   :  { %v170_v34 = vsel %vm167_vm6, %v169_v32, 0.0 }
 0x22a   :  { %v175_v35 = vadd.f32 %v174_v33, %v170_v34 }
 0x22c   :  { %176 = vst [vmem:[#allocation9] sm:$0x1] %v175_v35 }
 0x22d   :  { %328 = shalt.err (!%p325_p0)
}
 0x22e   :  { %s329_s6 = scalar_lea.hbm %s454_s3, 16 }
 0x22f   :  { %p330_p1 = scmp.ne.s32.totalorder %s454_s3, %s329_s6  ;;  %p333_p2 = scmp.lt.u32.totalorder %s329_s6, %s454_s3 }
 0x231   :  { %p335_p3 = pnand %p333_p2, %p330_p1 }
 0x233   :  { %338 = shalt.err (!%p335_p3)
}
 0x234   :  { %206 = dma.vmem_to_hbm [thread:$0]  %s204_s29, 16, %s454_s3, [#allocation8]  }
 0x235   :  { %341 = dma.done.wait [#allocation5], 16  }
 0x236   :  { %342 = vsyncadd [#allocation5], 4294967280 }
 0x237   :  { %343 = dma.done.wait [#allocation8], 32  }
 0x238   :  { %344 = vsyncadd [#allocation8], 4294967264 }
 0x239   :  { %216 = vsyncpa [#allocation4], 1 }
 0x23a   :  { %217 = vsyncpa [#allocation5], 1 }
 0x23b   :  { %218 = vsyncpa [#allocation8], 1 }

</bundles_post_ra>
